<compile_context>
chip_gen: v5e
topology: v5e:2x2
jax: 0.10.0
libtpu: 0.0.40
codegen_flags: <defaults>
</compile_context>

<pallas_src>
import functools

import jax
import jax.numpy as jnp
from jax.experimental import pallas as pl
from jax.experimental.pallas import tpu as pltpu

LANE = 128          # lane width; batch tiles must be a multiple of this
TB_MAX = 512        # max batch-lanes per grid step (amortizes per-step overhead)


def _round_up(x, m):
    return (x + m - 1) // m * m


def dnn_kernel(x_ref,
               w1_ref, b1_ref,
               w2_ref, b2_ref,
               w3_ref, b3_ref,
               w4_ref, b4_ref,
               o_ref):
    """One batch tile: x is (n_state, TB); weights are (out, in); biases (out, 1)."""
    x = x_ref[...]

    # input_layer + ReLU : (64, n_state) @ (n_state, TB) + (64, 1)
    h = jnp.dot(w1_ref[...], x, preferred_element_type=jnp.float32) + b1_ref[...]
    h = jnp.maximum(h, 0.0).astype(w2_ref.dtype)

    # middle_layer + ReLU : (32, 64) @ (64, TB) + (32, 1)
    h = jnp.dot(w2_ref[...], h, preferred_element_type=jnp.float32) + b2_ref[...]
    h = jnp.maximum(h, 0.0).astype(w3_ref.dtype)

    # middle_layer_2 + ReLU : (32, 32) @ (32, TB) + (32, 1)
    h = jnp.dot(w3_ref[...], h, preferred_element_type=jnp.float32) + b3_ref[...]
    h = jnp.maximum(h, 0.0).astype(w4_ref.dtype)

    # adv_layer (no activation) : (n_action_pad, 32) @ (32, TB) + (n_action_pad, 1)
    out = jnp.dot(w4_ref[...], h, preferred_element_type=jnp.float32) + b4_ref[...]
    o_ref[...] = out.astype(o_ref.dtype)


def dnn_forward(state, params, n_action, compute_dtype=jnp.float32):
    """state: (B, n_state) f32.  params: PyTorch-layout (out,in) weights and
    (out,1) biases, with the final layer zero-padded to a multiple of 8 rows.
    Returns (B, n_action) f32 Q-values."""
    B, n_state = state.shape
    n_act_pad = params["w4"].shape[0]
    h1, h2, h3 = params["w1"].shape[0], params["w2"].shape[0], params["w3"].shape[0]

    # Batch tiling: B on the lane axis, padded to a multiple of the tile.
    tb = min(TB_MAX, _round_up(B, LANE))
    b_pad = _round_up(B, tb)

    x_t = state.T                                       # (n_state, B)
    if b_pad != B:
        x_t = jnp.pad(x_t, ((0, 0), (0, b_pad - B)))    # zero-pad extra lanes

    cast = lambda a: a.astype(compute_dtype)
    args = (cast(x_t),
            cast(params["w1"]), params["b1"],
            cast(params["w2"]), params["b2"],
            cast(params["w3"]), params["b3"],
            cast(params["w4"]), params["b4"])

    const = lambda i: (0, 0)                            # weights/biases: resident
    in_specs = [
        pl.BlockSpec((n_state, tb), lambda i: (0, i)),  # state tile
        pl.BlockSpec((h1, n_state), const), pl.BlockSpec((h1, 1), const),
        pl.BlockSpec((h2, h1), const),      pl.BlockSpec((h2, 1), const),
        pl.BlockSpec((h3, h2), const),      pl.BlockSpec((h3, 1), const),
        pl.BlockSpec((n_act_pad, h3), const), pl.BlockSpec((n_act_pad, 1), const),
    ]
    out_specs = pl.BlockSpec((n_act_pad, tb), lambda i: (0, i))

    itemsize = jnp.dtype(compute_dtype).itemsize
    flops = 2 * b_pad * (n_state * h1 + h1 * h2 + h2 * h3 + h3 * n_act_pad)
    bytes_accessed = (x_t.size * itemsize
                      + sum(int(a.size) * a.dtype.itemsize for a in args[1:])
                      + n_act_pad * b_pad * 4)
    cost = pl.CostEstimate(flops=flops, transcendentals=0,
                           bytes_accessed=bytes_accessed)

    out_t = pl.pallas_call(
        dnn_kernel,
        out_shape=jax.ShapeDtypeStruct((n_act_pad, b_pad), jnp.float32),
        grid=(b_pad // tb,),
        in_specs=in_specs,
        out_specs=out_specs,
        compiler_params=pltpu.CompilerParams(
            dimension_semantics=("parallel",)),     # v7x: shard batch over 2 TCs
        cost_estimate=cost,
    )(*args)

    # Strip padding and return in the PyTorch (B, n_action) orientation.
    return out_t[:n_action, :B].T


def init_params(key, n_state, n_action):
    """PyTorch-layout init mirroring the module: weights (out,in) ~ N(0, 0.1);
    biases use nn.Linear's default uniform(-1/sqrt(fan_in), +1/sqrt(fan_in)).
    Final layer is zero-padded to a lane/sublane-friendly multiple of 8 rows."""
    ks = jax.random.split(key, 8)

    def linear(kw, kb, fan_in, fan_out):
        w = 0.1 * jax.random.normal(kw, (fan_out, fan_in), dtype=jnp.float32)
        bound = 1.0 / jnp.sqrt(jnp.float32(fan_in))
        b = jax.random.uniform(kb, (fan_out, 1), dtype=jnp.float32,
                               minval=-bound, maxval=bound)
        return w, b

    w1, b1 = linear(ks[0], ks[1], n_state, 64)
    w2, b2 = linear(ks[2], ks[3], 64, 32)
    w3, b3 = linear(ks[4], ks[5], 32, 32)
    w4, b4 = linear(ks[6], ks[7], 32, n_action)

    # Pad the adv_layer to 8 output rows once at init so the kernel never
    # touches a ragged (·,4) tail; padded rows are exact zeros.
    n_act_pad = _round_up(n_action, 8)
    if n_act_pad != n_action:
        w4 = jnp.pad(w4, ((0, n_act_pad - n_action), (0, 0)))
        b4 = jnp.pad(b4, ((0, n_act_pad - n_action), (0, 0)))

    return {"w1": w1, "b1": b1, "w2": w2, "b2": b2,
            "w3": w3, "b3": b3, "w4": w4, "b4": b4}


def dnn_reference(state, p, n_action):
    """Pure-JAX reference with the same PyTorch (out,in) parameter layout."""
    h = jax.nn.relu(state @ p["w1"].T + p["b1"].T)
    h = jax.nn.relu(h @ p["w2"].T + p["b2"].T)
    h = jax.nn.relu(h @ p["w3"].T + p["b3"].T)
    out = h @ p["w4"].T + p["b4"].T
    return out[:, :n_action]


if __name__ == "__main__":
    B, n_state, n_action = 8, 16, 4

    key = jax.random.PRNGKey(0)
    k_params, k_state = jax.random.split(key)
    params = init_params(k_params, n_state, n_action)
    state = jax.random.normal(k_state, (B, n_state), dtype=jnp.float32)

    out = dnn_forward(state, params, n_action)
    out = jax.block_until_ready(out)

    ref = dnn_reference(state, params, n_action)
    assert out.shape == (B, n_action)
    assert jnp.allclose(out, ref, atol=1e-4, rtol=1e-4), "mismatch vs reference"

    print("KERNEL_OK")
</pallas_src>

<mosaic_0001>
module attributes {stable_mosaic.version = 11 : i64} {
  func.func @dnn_kernel(%arg0: i32, %arg1: memref<16x128xf32, #tpu.memory_space<vmem>>, %arg2: memref<64x16xf32, #tpu.memory_space<vmem>>, %arg3: memref<64x1xf32, #tpu.memory_space<vmem>>, %arg4: memref<32x64xf32, #tpu.memory_space<vmem>>, %arg5: memref<32x1xf32, #tpu.memory_space<vmem>>, %arg6: memref<32x32xf32, #tpu.memory_space<vmem>>, %arg7: memref<32x1xf32, #tpu.memory_space<vmem>>, %arg8: memref<8x32xf32, #tpu.memory_space<vmem>>, %arg9: memref<8x1xf32, #tpu.memory_space<vmem>>, %arg10: memref<8x128xf32, #tpu.memory_space<vmem>>) attributes {dimension_semantics = [#tpu.dimension_semantics<parallel>], iteration_bounds = array<i64: 1>, scalar_prefetch = 0 : i64, scratch_operands = 0 : i64, tpu.core_type = #tpu.core_type<tc>, window_params = [{transform_indices = @transform_0, window_bounds = array<i64: 16, 128>}, {pipeline_mode = #tpu.pipeline_mode<synchronous>, transform_indices = @transform_1, window_bounds = array<i64: 64, 16>}, {pipeline_mode = #tpu.pipeline_mode<synchronous>, transform_indices = @transform_2, window_bounds = array<i64: 64, 1>}, {pipeline_mode = #tpu.pipeline_mode<synchronous>, transform_indices = @transform_3, window_bounds = array<i64: 32, 64>}, {pipeline_mode = #tpu.pipeline_mode<synchronous>, transform_indices = @transform_4, window_bounds = array<i64: 32, 1>}, {pipeline_mode = #tpu.pipeline_mode<synchronous>, transform_indices = @transform_5, window_bounds = array<i64: 32, 32>}, {pipeline_mode = #tpu.pipeline_mode<synchronous>, transform_indices = @transform_6, window_bounds = array<i64: 32, 1>}, {pipeline_mode = #tpu.pipeline_mode<synchronous>, transform_indices = @transform_7, window_bounds = array<i64: 8, 32>}, {pipeline_mode = #tpu.pipeline_mode<synchronous>, transform_indices = @transform_8, window_bounds = array<i64: 8, 1>}, {transform_indices = @transform_9, window_bounds = array<i64: 8, 128>}]} {
    %c0 = arith.constant 0 : index
    %c0_0 = arith.constant 0 : index
    %0 = vector.load %arg1[%c0, %c0_0] : memref<16x128xf32, #tpu.memory_space<vmem>>, vector<16x128xf32>
    %c0_1 = arith.constant 0 : index
    %c0_2 = arith.constant 0 : index
    %1 = vector.load %arg2[%c0_1, %c0_2] : memref<64x16xf32, #tpu.memory_space<vmem>>, vector<64x16xf32>
    %cst = arith.constant dense<0.000000e+00> : vector<64x128xf32>
    %2 = tpu.matmul %1, %0, %cst {dimension_numbers = #tpu.dot_dimension_numbers<[1], [0], [0], [1], [0, 0, 1, 1], [], []>} : vector<64x16xf32>, vector<16x128xf32>, vector<64x128xf32> -> vector<64x128xf32>
    %c0_3 = arith.constant 0 : index
    %c0_4 = arith.constant 0 : index
    %3 = vector.load %arg3[%c0_3, %c0_4] : memref<64x1xf32, #tpu.memory_space<vmem>>, vector<64x1xf32>
    %4 = vector.broadcast %3 : vector<64x1xf32> to vector<64x128xf32>
    %5 = arith.addf %2, %4 : vector<64x128xf32>
    %cst_5 = arith.constant 0.000000e+00 : f32
    %6 = vector.broadcast %cst_5 : f32 to vector<64x128xf32>
    %7 = arith.maximumf %5, %6 : vector<64x128xf32>
    %c0_6 = arith.constant 0 : index
    %c0_7 = arith.constant 0 : index
    %8 = vector.load %arg4[%c0_6, %c0_7] : memref<32x64xf32, #tpu.memory_space<vmem>>, vector<32x64xf32>
    %cst_8 = arith.constant dense<0.000000e+00> : vector<32x128xf32>
    %9 = tpu.matmul %8, %7, %cst_8 {dimension_numbers = #tpu.dot_dimension_numbers<[1], [0], [0], [1], [0, 0, 1, 1], [], []>} : vector<32x64xf32>, vector<64x128xf32>, vector<32x128xf32> -> vector<32x128xf32>
    %c0_9 = arith.constant 0 : index
    %c0_10 = arith.constant 0 : index
    %10 = vector.load %arg5[%c0_9, %c0_10] : memref<32x1xf32, #tpu.memory_space<vmem>>, vector<32x1xf32>
    %11 = vector.broadcast %10 : vector<32x1xf32> to vector<32x128xf32>
    %12 = arith.addf %9, %11 : vector<32x128xf32>
    %cst_11 = arith.constant 0.000000e+00 : f32
    %13 = vector.broadcast %cst_11 : f32 to vector<32x128xf32>
    %14 = arith.maximumf %12, %13 : vector<32x128xf32>
    %c0_12 = arith.constant 0 : index
    %c0_13 = arith.constant 0 : index
    %15 = vector.load %arg6[%c0_12, %c0_13] : memref<32x32xf32, #tpu.memory_space<vmem>>, vector<32x32xf32>
    %cst_14 = arith.constant dense<0.000000e+00> : vector<32x128xf32>
    %16 = tpu.matmul %15, %14, %cst_14 {dimension_numbers = #tpu.dot_dimension_numbers<[1], [0], [0], [1], [0, 0, 1, 1], [], []>} : vector<32x32xf32>, vector<32x128xf32>, vector<32x128xf32> -> vector<32x128xf32>
    %c0_15 = arith.constant 0 : index
    %c0_16 = arith.constant 0 : index
    %17 = vector.load %arg7[%c0_15, %c0_16] : memref<32x1xf32, #tpu.memory_space<vmem>>, vector<32x1xf32>
    %18 = vector.broadcast %17 : vector<32x1xf32> to vector<32x128xf32>
    %19 = arith.addf %16, %18 : vector<32x128xf32>
    %cst_17 = arith.constant 0.000000e+00 : f32
    %20 = vector.broadcast %cst_17 : f32 to vector<32x128xf32>
    %21 = arith.maximumf %19, %20 : vector<32x128xf32>
    %c0_18 = arith.constant 0 : index
    %c0_19 = arith.constant 0 : index
    %22 = vector.load %arg8[%c0_18, %c0_19] : memref<8x32xf32, #tpu.memory_space<vmem>>, vector<8x32xf32>
    %cst_20 = arith.constant dense<0.000000e+00> : vector<8x128xf32>
    %23 = tpu.matmul %22, %21, %cst_20 {dimension_numbers = #tpu.dot_dimension_numbers<[1], [0], [0], [1], [0, 0, 1, 1], [], []>} : vector<8x32xf32>, vector<32x128xf32>, vector<8x128xf32> -> vector<8x128xf32>
    %c0_21 = arith.constant 0 : index
    %c0_22 = arith.constant 0 : index
    %24 = vector.load %arg9[%c0_21, %c0_22] : memref<8x1xf32, #tpu.memory_space<vmem>>, vector<8x1xf32>
    %25 = vector.broadcast %24 : vector<8x1xf32> to vector<8x128xf32>
    %26 = arith.addf %23, %25 : vector<8x128xf32>
    %c0_23 = arith.constant 0 : index
    %c0_24 = arith.constant 0 : index
    %27 = vector.load %arg10[%c0_23, %c0_24] : memref<8x128xf32, #tpu.memory_space<vmem>>, vector<8x128xf32>
    tpu.vector_store %arg10[%c0_23, %c0_24], %26 {strides = array<i32>} : memref<8x128xf32, #tpu.memory_space<vmem>>, vector<8x128xf32>,
    return
  }
  func.func @transform_0(%arg0: i32) -> (i32, i32) {
    %c0_i32 = arith.constant 0 : i32
    %c0_i32_0 = arith.constant 0 : i32
    return %c0_i32, %arg0 : i32, i32
  }
  func.func @transform_1(%arg0: i32) -> (i32, i32) {
    %c0_i32 = arith.constant 0 : i32
    %c0_i32_0 = arith.constant 0 : i32
    %c0_i32_1 = arith.constant 0 : i32
    return %c0_i32, %c0_i32_0 : i32, i32
  }
  func.func @transform_2(%arg0: i32) -> (i32, i32) {
    %c0_i32 = arith.constant 0 : i32
    %c0_i32_0 = arith.constant 0 : i32
    %c0_i32_1 = arith.constant 0 : i32
    return %c0_i32, %c0_i32_0 : i32, i32
  }
  func.func @transform_3(%arg0: i32) -> (i32, i32) {
    %c0_i32 = arith.constant 0 : i32
    %c0_i32_0 = arith.constant 0 : i32
    %c0_i32_1 = arith.constant 0 : i32
    return %c0_i32, %c0_i32_0 : i32, i32
  }
  func.func @transform_4(%arg0: i32) -> (i32, i32) {
    %c0_i32 = arith.constant 0 : i32
    %c0_i32_0 = arith.constant 0 : i32
    %c0_i32_1 = arith.constant 0 : i32
    return %c0_i32, %c0_i32_0 : i32, i32
  }
  func.func @transform_5(%arg0: i32) -> (i32, i32) {
    %c0_i32 = arith.constant 0 : i32
    %c0_i32_0 = arith.constant 0 : i32
    %c0_i32_1 = arith.constant 0 : i32
    return %c0_i32, %c0_i32_0 : i32, i32
  }
  func.func @transform_6(%arg0: i32) -> (i32, i32) {
    %c0_i32 = arith.constant 0 : i32
    %c0_i32_0 = arith.constant 0 : i32
    %c0_i32_1 = arith.constant 0 : i32
    return %c0_i32, %c0_i32_0 : i32, i32
  }
  func.func @transform_7(%arg0: i32) -> (i32, i32) {
    %c0_i32 = arith.constant 0 : i32
    %c0_i32_0 = arith.constant 0 : i32
    %c0_i32_1 = arith.constant 0 : i32
    return %c0_i32, %c0_i32_0 : i32, i32
  }
  func.func @transform_8(%arg0: i32) -> (i32, i32) {
    %c0_i32 = arith.constant 0 : i32
    %c0_i32_0 = arith.constant 0 : i32
    %c0_i32_1 = arith.constant 0 : i32
    return %c0_i32, %c0_i32_0 : i32, i32
  }
  func.func @transform_9(%arg0: i32) -> (i32, i32) {
    %c0_i32 = arith.constant 0 : i32
    %c0_i32_0 = arith.constant 0 : i32
    return %c0_i32, %arg0 : i32, i32
  }
}

</mosaic_0001>

<bundles_post_ra>
// kernel: tpu_custom_call.1
= control target key start
LH: loop header
LB: loop body
LE: loop exit
PB: predicated region body
PF: predicated region fallthrough
CT: control target
= control target key end

     0   :  { %v410_v3 = vmov 0   ;;  %vm91_vm0 = vcmask 130048   ;;  %s586_s0 = inlined_call_operand.vmem [shape: f32[16,128], index: 0, kind: input, shape index: {}]   ;;  %s587_s1 = inlined_call_operand.vmem [shape: f32[64,16], index: 1, kind: input, shape index: {}]   ;;  %s588_s2 = inlined_call_operand.vmem [shape: f32[64,1], index: 2, kind: input, shape index: {}]   ;;  %s589_s3 = inlined_call_operand.vmem [shape: f32[32,64], index: 3, kind: input, shape index: {}]   ;;  %s590_s4 = inlined_call_operand.vmem [shape: f32[32,1], index: 4, kind: input, shape index: {}]   ;;  %s591_s5 = inlined_call_operand.vmem [shape: f32[32,32], index: 5, kind: input, shape index: {}]   ;;  %s592_s6 = inlined_call_operand.vmem [shape: f32[32,1], index: 6, kind: input, shape index: {}]   ;;  %s593_s7 = inlined_call_operand.vmem [shape: f32[8,32], index: 7, kind: input, shape index: {}]   ;;  %s594_s8 = inlined_call_operand.vmem [shape: f32[8,1], index: 8, kind: input, shape index: {}]   ;;  %s595_s9 = inlined_call_operand.hbm [shape: f32[8,128], index: 9, kind: output, shape index: {}]  }
   0x1   :  { %v34_v0 = vld [vmem:[%s586_s0 + $0x8] sm:$0xff]  ;;  %v50_v1 = vld [vmem:[%s588_s2 + $0x38] sm:$0xff]  ;;  %382 = vset.pattern.permute.xlu1 %v410_v3  ;;  %381 = vset.pattern.permute.xlu0 %v410_v3  ;;  %v33_v4 = vld [vmem:[%s586_s0] sm:$0xff] }
   0x2   :  { %v48_v2 = vld [vmem:[%s588_s2 + $0x28] sm:$0xff]  ;;  %130 = vmatpush.msra.mxu0 %v34_v0  ;;  %377 = vmatpush.msra.mxu3 %v34_v0  ;;  %v35_v5 = vld [vmem:[%s587_s1] sm:$0xff]  ;;  %v46_v7 = vld [vmem:[%s588_s2 + $0x18] sm:$0xff] }
   0x3   :  { %v40_v6 = vld [vmem:[%s587_s1 + $0x28] sm:$0xff]  ;;  %88 = vperm.xlu0 %381, %v50_v1   ;;  %78 = vperm.xlu1 %382, %v48_v2  }
   0x4   :  { %131 = vmatpush.msra.mxu0 %v33_v4  ;;  %378 = vmatpush.msra.mxu3 %v33_v4 }
   0x5   :  { %360 = vmatmul.msk.f32.vlgmr.msra.gmra.mxu0 %vm91_vm0, %v35_v5  ;;  %365 = vmatmul.msk.f32.vlgmr.msra.gmra.mxu3 %vm91_vm0, %v40_v6 }
   0x6   :  { %383 = vset.pattern.permute.xlu2 %v410_v3 }
   0x7   :  { %68 = vperm.xlu2 %383, %v46_v7  }
   0x8   :  { %14 = vsyncpa [#allocation3], 0  ;;  %v49_v8 = vld [vmem:[%s588_s2 + $0x30] sm:$0xff]  ;;  %v47_v9 = vld [vmem:[%s588_s2 + $0x20] sm:$0xff]  ;;  %vm193_vm1 = vcmask 523264   ;;  %vm267_vm2 = vcmask 261120  }
   0x9   :  { %v36_v10 = vld [vmem:[%s587_s1 + $0x8] sm:$0xff]  ;;  %v41_v11 = vld [vmem:[%s587_s1 + $0x30] sm:$0xff]  ;;  %v43_v14 = vld [vmem:[%s588_s2] sm:$0xff]  ;;  %s411_s28 = smov [#allocation2]   ;;  %s351_s11 = sshll.u32 %s595_s9, 4  ;;  %s352_s11 = int_to_ptr.hbm [resolvable:$true] %s351_s11 }
   0xa   :  { %v45_v12 = vld [vmem:[%s588_s2 + $0x10] sm:$0xff]  ;;  %v44_v13 = vld [vmem:[%s588_s2 + $0x8] sm:$0xff]  ;;  %v42_v16 = vld [vmem:[%s587_s1 + $0x38] sm:$0xff]  ;;  %s349_s29 = sshll.u32 %s411_s28, 4  ;;  %s350_s29 = int_to_ptr.vmem [resolvable:$true] %s349_s29 }
   0xb   :  { %83 = vperm.xlu0 %381, %v49_v8   ;;  %73 = vperm.xlu1 %382, %v47_v9   ;;  %v37_v15 = vld [vmem:[%s587_s1 + $0x10] sm:$0xff]  ;;  %v172_v17 = vld [vmem:[%s590_s4 + $0x18] sm:$0xff]  ;;  %v170_v19 = vld [vmem:[%s590_s4 + $0x8] sm:$0xff] }
   0xc   :  { %v171_v18 = vld [vmem:[%s590_s4 + $0x10] sm:$0xff]  ;;  %v38_v20 = vld [vmem:[%s587_s1 + $0x18] sm:$0xff]  ;;  %v169_v21 = vld [vmem:[%s590_s4] sm:$0xff] }
   0xd   :  { %361 = vmatmul.msk.f32.gmra.mxu0 %vm91_vm0, %v36_v10  ;;  %366 = vmatmul.msk.f32.gmra.mxu3 %vm91_vm0, %v41_v11  ;;  %v246_v22 = vld [vmem:[%s592_s6 + $0x18] sm:$0xff]  ;;  %v245_v23 = vld [vmem:[%s592_s6 + $0x10] sm:$0xff]  ;;  %v39_v24 = vld [vmem:[%s587_s1 + $0x20] sm:$0xff] }
   0xe   :  { %v244_v25 = vld [vmem:[%s592_s6 + $0x8] sm:$0xff]  ;;  %v243_v26 = vld [vmem:[%s592_s6] sm:$0xff]  ;;  %v167_v62 = vld [vmem:[%s589_s3 + $0x10] sm:$0xff] }
   0xf   :  { %63 = vperm.xlu2 %383, %v45_v12   ;;  %v314_v27 = vld [vmem:[%s594_s8] sm:$0xff]  ;;  %v166_v61 = vld [vmem:[%s589_s3 + $0x8] sm:$0xff]  ;;  %v168_v63 = vld [vmem:[%s589_s3 + $0x18] sm:$0xff] }
  0x10   :  { %v165_v60 = vld [vmem:[%s589_s3] sm:$0xff] }
  0x13   :  { %58 = vperm.xlu0 %381, %v44_v13   ;;  %53 = vperm.xlu1 %382, %v43_v14  }
  0x15   :  { %362 = vmatmul.msk.f32.gmra.mxu0 %vm91_vm0, %v37_v15  ;;  %367 = vmatmul.msk.f32.gmra.mxu3 %vm91_vm0, %v42_v16  ;;  %v239_v16 = vld [vmem:[%s591_s5] sm:$0xff] }
  0x17   :  { %190 = vperm.xlu2 %383, %v172_v17   ;;  %v240_v17 = vld [vmem:[%s591_s5 + $0x8] sm:$0xff] }
  0x1b   :  { %185 = vperm.xlu0 %381, %v171_v18   ;;  %180 = vperm.xlu1 %382, %v170_v19   ;;  %v241_v18 = vld [vmem:[%s591_s5 + $0x10] sm:$0xff]  ;;  %v242_v19 = vld [vmem:[%s591_s5 + $0x18] sm:$0xff] }
  0x1d   :  { %363 = vmatmul.msk.f32.gmra.mxu0 %vm91_vm0, %v38_v20 }
  0x1f   :  { %175 = vperm.xlu2 %383, %v169_v21  }
  0x23   :  { %264 = vperm.xlu0 %381, %v246_v22   ;;  %259 = vperm.xlu1 %382, %v245_v23  }
  0x25   :  { %364 = vmatmul.msk.f32.gmra.mxu0 %vm91_vm0, %v39_v24 }
  0x27   :  { %254 = vperm.xlu2 %383, %v244_v25  }
  0x2b   :  { %249 = vperm.xlu0 %381, %v243_v26   ;;  %317 = vperm.xlu1 %382, %v314_v27  }
  0x61   :  { %v69_v39 = vpop.permute.xlu2 %68 }
  0x69   :  { %v64_v49 = vpop.permute.xlu2 %63 }
  0x71   :  { %v191_v3 = vpop.permute.xlu2 %190 }
  0x75   :  { %v89_v31 = vpop.permute.xlu0 %88  ;;  %v79_v33 = vpop.permute.xlu1 %78 }
  0x79   :  { %v176_v11 = vpop.permute.xlu2 %175 }
  0x7d   :  { %v84_v35 = vpop.permute.xlu0 %83  ;;  %v74_v43 = vpop.permute.xlu1 %73 }
  0x82   :  { %v133_v28 = vpop.f32.mrf.mxu0 }
  0x85   :  { %v59_v52 = vpop.permute.xlu0 %58  ;;  %v54_v53 = vpop.permute.xlu1 %53 }
  0x86   :  { %v134_v56 = vadd.f32 %v133_v28, %v54_v53  ;;  %v255_v28 = vpop.permute.xlu2 %254 }
  0x88   :  { %v148_v29 = vpop.f32.mrf.mxu3  ;;  %v157_v59 = vmax.f32 %v134_v56, 0.0 }
  0x89   :  { %v149_v41 = vadd.f32 %v148_v29, %v79_v33 }
  0x8a   :  { %v136_v30 = vpop.f32.mrf.mxu0 }
  0x8b   :  { %v162_v45 = vmax.f32 %v149_v41, 0.0  ;;  %v137_v54 = vadd.f32 %v136_v30, %v59_v52 }
  0x8d   :  { %v158_v58 = vmax.f32 %v137_v54, 0.0  ;;  %v186_v4 = vpop.permute.xlu0 %185  ;;  %v181_v8 = vpop.permute.xlu1 %180 }
  0x90   :  { %v151_v32 = vpop.f32.mrf.mxu3 }
  0x91   :  { %v152_v37 = vadd.f32 %v151_v32, %v84_v35 }
  0x92   :  { %v139_v34 = vpop.f32.mrf.mxu0 }
  0x93   :  { %v163_v44 = vmax.f32 %v152_v37, 0.0  ;;  %v140_v50 = vadd.f32 %v139_v34, %v64_v49 }
  0x95   :  { %v159_v57 = vmax.f32 %v140_v50, 0.0  ;;  %v265_v23 = vpop.permute.xlu0 %264  ;;  %v260_v24 = vpop.permute.xlu1 %259 }
  0x98   :  { %v154_v36 = vpop.f32.mrf.mxu3 }
  0x99   :  { %v155_v38 = vadd.f32 %v154_v36, %v89_v31  ;;  %v313_v36 = vld [vmem:[%s593_s7] sm:$0xff] }
  0x9a   :  { %v142_v40 = vpop.f32.mrf.mxu0 }
  0x9b   :  { %v164_v42 = vmax.f32 %v155_v38, 0.0  ;;  %v143_v47 = vadd.f32 %v142_v40, %v69_v39 }
  0x9d   :  { %214 = vmatpush.msra.mxu1 %v164_v42  ;;  %v160_v55 = vmax.f32 %v143_v47, 0.0  ;;  %v250_v31 = vpop.permute.xlu0 %249  ;;  %v318_v37 = vpop.permute.xlu1 %317 }
  0x9f   :  { %215 = vmatpush.msra.mxu1 %v163_v44 }
  0xa1   :  { %216 = vmatpush.msra.mxu1 %v162_v45 }
  0xa2   :  { %v145_v46 = vpop.f32.mrf.mxu0 }
  0xa3   :  { %v146_v48 = vadd.f32 %v145_v46, %v74_v43 }
  0xa5   :  { %v161_v51 = vmax.f32 %v146_v48, 0.0 }
  0xa7   :  { %217 = vmatpush.msra.mxu1 %v161_v51 }
  0xa9   :  { %218 = vmatpush.msra.mxu1 %v160_v55 }
  0xab   :  { %219 = vmatpush.msra.mxu1 %v159_v57 }
  0xad   :  { %220 = vmatpush.msra.mxu1 %v158_v58 }
  0xaf   :  { %221 = vmatpush.msra.mxu1 %v157_v59 }
  0xb0   :  { %368 = vmatmul.msk.f32.vlgmr.msra.gmra.mxu1 %vm193_vm1, %v165_v60 }
  0xb8   :  { %369 = vmatmul.msk.f32.gmra.mxu1 %vm193_vm1, %v166_v61 }
  0xc0   :  { %370 = vmatmul.msk.f32.gmra.mxu1 %vm193_vm1, %v167_v62 }
  0xc8   :  { %371 = vmatmul.msk.f32.gmra.mxu1 %vm193_vm1, %v168_v63 }
 0x12d   :  { %v223_v0 = vpop.f32.mrf.mxu1 }
 0x12e   :  { %v224_v12 = vadd.f32 %v223_v0, %v176_v11 }
 0x130   :  { %v235_v15 = vmax.f32 %v224_v12, 0.0 }
 0x135   :  { %v226_v1 = vpop.f32.mrf.mxu1 }
 0x136   :  { %v227_v9 = vadd.f32 %v226_v1, %v181_v8 }
 0x138   :  { %v236_v14 = vmax.f32 %v227_v9, 0.0 }
 0x13d   :  { %v229_v2 = vpop.f32.mrf.mxu1 }
 0x13e   :  { %v230_v6 = vadd.f32 %v229_v2, %v186_v4 }
 0x140   :  { %v237_v13 = vmax.f32 %v230_v6, 0.0 }
 0x145   :  { %v232_v5 = vpop.f32.mrf.mxu1 }
 0x146   :  { %v233_v7 = vadd.f32 %v232_v5, %v191_v3 }
 0x148   :  { %v238_v10 = vmax.f32 %v233_v7, 0.0 }
 0x14a   :  { %292 = vmatpush.msra.mxu2 %v238_v10 }
 0x14c   :  { %293 = vmatpush.msra.mxu2 %v237_v13 }
 0x14e   :  { %294 = vmatpush.msra.mxu2 %v236_v14 }
 0x150   :  { %295 = vmatpush.msra.mxu2 %v235_v15 }
 0x151   :  { %372 = vmatmul.msk.f32.vlgmr.msra.gmra.mxu2 %vm267_vm2, %v239_v16 }
 0x159   :  { %373 = vmatmul.msk.f32.gmra.mxu2 %vm267_vm2, %v240_v17 }
 0x161   :  { %374 = vmatmul.msk.f32.gmra.mxu2 %vm267_vm2, %v241_v18 }
 0x169   :  { %375 = vmatmul.msk.f32.gmra.mxu2 %vm267_vm2, %v242_v19 }
 0x1d4   :  { %v297_v20 = vpop.f32.mrf.mxu2 }
 0x1d5   :  { %v298_v32 = vadd.f32 %v297_v20, %v250_v31 }
 0x1d7   :  { %v309_v35 = vmax.f32 %v298_v32, 0.0 }
 0x1dc   :  { %v300_v21 = vpop.f32.mrf.mxu2 }
 0x1dd   :  { %v301_v29 = vadd.f32 %v300_v21, %v255_v28 }
 0x1df   :  { %v310_v34 = vmax.f32 %v301_v29, 0.0 }
 0x1e4   :  { %v303_v22 = vpop.f32.mrf.mxu2 }
 0x1e5   :  { %v304_v26 = vadd.f32 %v303_v22, %v260_v24 }
 0x1e7   :  { %v311_v33 = vmax.f32 %v304_v26, 0.0 }
 0x1ec   :  { %v306_v25 = vpop.f32.mrf.mxu2 }
 0x1ed   :  { %v307_v27 = vadd.f32 %v306_v25, %v265_v23 }
 0x1ef   :  { %v312_v30 = vmax.f32 %v307_v27, 0.0 }
 0x1f1   :  { %335 = vmatpush.msrb.mxu3 %v312_v30 }
 0x1f3   :  { %336 = vmatpush.msrb.mxu3 %v311_v33 }
 0x1f5   :  { %337 = vmatpush.msrb.mxu3 %v310_v34 }
 0x1f7   :  { %338 = vmatpush.msrb.mxu3 %v309_v35 }
 0x1f8   :  { %376 = vmatmul.msk.f32.vlgmr.msrb.gmra.mxu3 %vm267_vm2, %v313_v36 }
 0x27b   :  { %v340_v38 = vpop.f32.mrf.mxu3 }
 0x27c   :  { %v341_v39 = vadd.f32 %v340_v38, %v318_v37 }
 0x27e   :  { %343 = vst [vmem:[#allocation2] sm:$0xff] %v341_v39 }
 0x27f   :  { %354 = dma.vmem_to_hbm [thread:$0]  %s350_s29, 128, %s352_s11, [#allocation3]  }
 0x280   :  { %408 = dma.done.wait [#allocation3], 128  }
 0x281   :  { %409 = vsyncadd [#allocation3], 4294967168 }
 0x282   :  { %359 = vsyncpa [#allocation3], 1 }

</bundles_post_ra>
